<compile_context>
chip_gen: v6e
topology: v6e:2x2x1
jax: 0.10.0
libtpu: 0.0.40
codegen_flags: <defaults>
</compile_context>

<pallas_src>
import math

import jax
import jax.numpy as jnp
from jax.experimental import pallas as pl
from jax.experimental.pallas import tpu as pltpu


# ---------------------------------------------------------------------------
# Fused RHN kernel builder
# ---------------------------------------------------------------------------
def make_rhn_call(seq_len, rec_depth, num_layers, batch, features,
                  *, batch_tile=None, out_dtype=jnp.float32):
    """Builds a pallas_call applying the full RHN recurrence in one launch.

    Call signature of the returned callable:
        out = call(seed0, w_fused, b_fused)
      seed0   : (B, F)      seed of timestep 0 (sequence[0] or hidden_init[-1])
      w_fused : (L, F, 2F)  bf16, [Wp^T | Wt^T] per layer
      b_fused : (L, 1, 2F)  f32,  [bp   | bt  ] per layer
      out     : (T, B, F)   final hidden states (all timesteps)
    """
    # TODO(synk): F must be a multiple of 128 (lane width); arbitrary F would
    # need a masked softmax over padded lanes.
    assert features % 128 == 0, "features must be a multiple of 128 (lane axis)"
    assert batch % 8 == 0, "batch must be a multiple of 8 (f32 sublane axis)"
    assert rec_depth >= 1 and num_layers >= 1 and seq_len >= 1

    F = features
    L = num_layers

    # --- batch-tile heuristic -------------------------------------------------
    #  * >= 2 tiles once batch >= 16 so the "parallel" axis can shard across
    #    TensorCores (v7x megacore);
    #  * cap a tile at 256 rows (fills the v6e/v7x 256-row MXU, 2x the v5e one);
    #  * single full-batch tile at tiny batch (overhead-bound regime).
    if batch_tile is None:
        if batch >= 16:
            batch_tile = min(256, batch // 2)
        else:
            batch_tile = batch
        batch_tile = max(8, (batch_tile // 8) * 8)
        while batch % batch_tile:
            batch_tile -= 8
    assert batch % batch_tile == 0 and batch_tile % 8 == 0
    Bt = batch_tile

    grid = (batch // Bt, seq_len)

    # For T > 1 every rec_depth iteration recomputes the same value (seed is
    # unchanged within a timestep), so a single application is exact.  For
    # T == 1 the iterations genuinely chain (hidden[-1] is hidden[0]).
    depth_iters = rec_depth if seq_len == 1 else 1

    def kernel(seed_ref, w_ref, b_ref, out_ref, h_ref):
        t = pl.program_id(1)

        # Seed the carried state at the first timestep of each batch tile.
        @pl.when(t == 0)
        def _():
            h_ref[...] = seed_ref[...].astype(jnp.float32)

        h = h_ref[...]                                       # (Bt, F) f32
        for _ in range(depth_iters):                         # 1 unless T == 1
            for l in range(L):                               # static unroll
                w = w_ref[l]                                 # (F, 2F) bf16
                b = b_ref[l]                                 # (1, 2F) f32
                y = jnp.dot(h.astype(w.dtype), w,
                            preferred_element_type=jnp.float32) + b   # (Bt, 2F)

                plain = jnp.maximum(y[:, :F], 0.0)           # relu(plain_layer(h))
                logits = y[:, F:]                            # transform_layer(h)
                m = jnp.max(logits, axis=-1, keepdims=True)
                e = jnp.exp(logits - m)
                denom = jnp.sum(e, axis=-1, keepdims=True)
                tgate = e * pl.reciprocal(denom, approx=True)  # softmax over F

                # (1 - t) * h + t * plain  ==  h + t * (plain - h)
                h = h + tgate * (plain - h)

        h_ref[...] = h                    # carry hidden[t] to the next timestep
        out_ref[0] = h.astype(out_ref.dtype)

    # --- explicit VMEM budget (weights resident + tiny per-step blocks) -------
    f32b, bf16b = 4, 2
    out_b = jnp.dtype(out_dtype).itemsize
    est = (2 * L * F * 2 * F * bf16b      # fused weights (allow double-buffer)
           + 2 * L * 2 * F * f32b         # fused biases
           + 2 * Bt * F * f32b            # seed input block
           + 2 * Bt * F * out_b           # output block
           + Bt * F * f32b                # h scratch
           + 2 * Bt * 2 * F * f32b)       # matmul/softmax working set headroom
    try:
        vmem_cap = int(pltpu.get_tpu_info().vmem_capacity_bytes)
    except Exception:
        vmem_cap = 64 * 1024 * 1024       # assume the smallest (v7x per-TC)
    vmem_limit = int(min(max(2 * est, 16 * 1024 * 1024), (3 * vmem_cap) // 4))

    # --- cost estimate so XLA schedules surrounding ops sensibly --------------
    flops = 2 * seq_len * depth_iters * L * batch * F * (2 * F)
    transcendentals = seq_len * depth_iters * L * batch * F
    bytes_accessed = (L * F * 2 * F * bf16b + L * 2 * F * f32b
                      + batch * F * f32b + seq_len * batch * F * out_b)
    cost = pl.CostEstimate(flops=flops, transcendentals=transcendentals,
                           bytes_accessed=bytes_accessed)

    grid_spec = pltpu.PrefetchScalarGridSpec(
        num_scalar_prefetch=0,
        grid=grid,
        in_specs=[
            pl.BlockSpec((Bt, F), lambda bb, t: (bb, 0)),            # seed0
            pl.BlockSpec((L, F, 2 * F), lambda bb, t: (0, 0, 0)),    # [Wp^T|Wt^T]
            pl.BlockSpec((L, 1, 2 * F), lambda bb, t: (0, 0, 0)),    # [bp|bt]
        ],
        out_specs=pl.BlockSpec((1, Bt, F), lambda bb, t: (t, bb, 0)),
        scratch_shapes=[pltpu.VMEM((Bt, F), jnp.float32)],           # carried h
    )

    return pl.pallas_call(
        kernel,
        out_shape=jax.ShapeDtypeStruct((seq_len, batch, F), out_dtype),
        grid_spec=grid_spec,
        compiler_params=pltpu.CompilerParams(
            dimension_semantics=("parallel", "arbitrary"),
            vmem_limit_bytes=vmem_limit),
        cost_estimate=cost,
    )


# ---------------------------------------------------------------------------
# Parameter init (mirrors nn.Linear default init; transform bias filled = -1)
# ---------------------------------------------------------------------------
def init_params(key, num_layers, features, transform_bias=-1.0):
    k = 1.0 / math.sqrt(features)
    wps, bps, wts, bts = [], [], [], []
    for _ in range(num_layers):
        key, k1, k2, k3 = jax.random.split(key, 4)
        wps.append(jax.random.uniform(k1, (features, features), jnp.float32, -k, k))
        bps.append(jax.random.uniform(k2, (features,), jnp.float32, -k, k))
        wts.append(jax.random.uniform(k3, (features, features), jnp.float32, -k, k))
        bts.append(jnp.full((features,), transform_bias, jnp.float32))
    return jnp.stack(wps), jnp.stack(bps), jnp.stack(wts), jnp.stack(bts)


def fuse_params(wp, bp, wt, bt):
    """Fuse per-layer (Wp, Wt) -> (F, 2F) bf16 and (bp, bt) -> (1, 2F) f32."""
    w = jnp.concatenate([jnp.swapaxes(wp, 1, 2), jnp.swapaxes(wt, 1, 2)], axis=-1)
    b = jnp.concatenate([bp, bt], axis=-1)[:, None, :]
    return w.astype(jnp.bfloat16), b.astype(jnp.float32)


# ---------------------------------------------------------------------------
# Pure-JAX reference: literal port of RecurrentHighwayNetwork.forward (f32)
# ---------------------------------------------------------------------------
def rhn_reference(sequence, hidden_init, wp, bp, wt, bt, rec_depth):
    hidden = [hidden_init[t] for t in range(hidden_init.shape[0])]
    num_layers = wp.shape[0]
    i = 0
    cur_depth = 0
    for step in range(sequence.shape[0]):
        x = sequence[step]
        for _ in range(rec_depth):
            if i == 0 and cur_depth == 0:
                h = x
            else:
                h = hidden[i - 1]
            for l in range(num_layers):
                plain = jax.nn.relu(h @ wp[l].T + bp[l])
                trans = jax.nn.softmax(h @ wt[l].T + bt[l], axis=-1)
                h = (1.0 - trans) * h + plain * trans
            hidden[i] = h
            cur_depth += 1
        i += 1
    return jnp.stack(hidden)


# ---------------------------------------------------------------------------
# Wrapper: returns the stacked hidden states (T, B, F) in one kernel launch
# ---------------------------------------------------------------------------
def rhn_forward(sequence, hidden_init, w_fused, b_fused, rec_depth):
    T, B, F = sequence.shape
    L = w_fused.shape[0]
    call = make_rhn_call(T, rec_depth, L, B, F)
    # Module quirk: only sequence[0] and (for T>1, rec_depth>1) hidden[-1]
    # influence the output.  Pick the timestep-0 seed statically.
    if T == 1 or rec_depth == 1:
        seed0 = sequence[0]
    else:
        seed0 = hidden_init[-1]
    return call(seed0, w_fused, b_fused)


if __name__ == "__main__":
    F = 128                      # features (lane-aligned)
    NUM_LAYERS = 2
    REC_DEPTH = 3

    key = jax.random.PRNGKey(0)
    key, k_seq, k_hid, k_seq1, k_hid1 = jax.random.split(key, 5)
    wp, bp, wt, bt = init_params(key, NUM_LAYERS, F)
    w_fused, b_fused = fuse_params(wp, bp, wt, bt)

    # --- case 1: T > 1 (deduped depth, 2 batch tiles -> "parallel" axis) ---
    T, B = 6, 16
    sequence = jax.random.normal(k_seq, (T, B, F), jnp.float32)
    hidden_init = jax.random.normal(k_hid, (T, B, F), jnp.float32)

    out = rhn_forward(sequence, hidden_init, w_fused, b_fused, REC_DEPTH)
    jax.block_until_ready(out)
    ref = rhn_reference(sequence, hidden_init, wp, bp, wt, bt, REC_DEPTH)
    err1 = float(jnp.max(jnp.abs(out - ref)))
    assert out.shape == (T, B, F)
    assert bool(jnp.all(jnp.isfinite(out)))
    assert err1 < 0.1, f"T>1 case: max abs error vs reference too large: {err1}"

    # --- case 2: T == 1 (chained rec_depth inside the kernel body) ---
    T1, B1 = 1, 8
    sequence1 = jax.random.normal(k_seq1, (T1, B1, F), jnp.float32)
    hidden_init1 = jax.random.normal(k_hid1, (T1, B1, F), jnp.float32)

    out1 = rhn_forward(sequence1, hidden_init1, w_fused, b_fused, REC_DEPTH)
    jax.block_until_ready(out1)
    ref1 = rhn_reference(sequence1, hidden_init1, wp, bp, wt, bt, REC_DEPTH)
    err2 = float(jnp.max(jnp.abs(out1 - ref1)))
    assert out1.shape == (T1, B1, F)
    assert bool(jnp.all(jnp.isfinite(out1)))
    assert err2 < 0.1, f"T==1 case: max abs error vs reference too large: {err2}"

    print("KERNEL_OK")
</pallas_src>

<mosaic_0001>
module attributes {stable_mosaic.version = 11 : i64} {
  func.func @kernel(%arg0: i32, %arg1: i32, %arg2: memref<8x128xf32, #tpu.memory_space<vmem>>, %arg3: memref<2x128x256xbf16, #tpu.memory_space<vmem>>, %arg4: memref<2x1x256xf32, #tpu.memory_space<vmem>>, %arg5: memref<1x8x128xf32, #tpu.memory_space<vmem>>, %arg6: memref<8x128xf32, #tpu.memory_space<vmem>>) attributes {dimension_semantics = [#tpu.dimension_semantics<parallel>, #tpu.dimension_semantics<arbitrary>], iteration_bounds = array<i64: 2, 6>, scalar_prefetch = 0 : i64, scratch_operands = 1 : i64, tpu.core_type = #tpu.core_type<tc>, window_params = [{transform_indices = @transform_0, window_bounds = array<i64: 8, 128>}, {pipeline_mode = #tpu.pipeline_mode<synchronous>, transform_indices = @transform_1, window_bounds = array<i64: 2, 128, 256>}, {pipeline_mode = #tpu.pipeline_mode<synchronous>, transform_indices = @transform_2, window_bounds = array<i64: 2, 1, 256>}, {transform_indices = @transform_3, window_bounds = array<i64: 1, 8, 128>}]} {
    %c0_i32 = arith.constant 0 : i32
    %0 = arith.cmpi eq, %arg1, %c0_i32 : i32
    %1 = arith.extui %0 : i1 to i32
    %c0_i32_0 = arith.constant 0 : i32
    %2 = arith.cmpi ne, %1, %c0_i32_0 : i32
    scf.if %2 {
      %c0_25 = arith.constant 0 : index
      %c0_26 = arith.constant 0 : index
      %58 = vector.load %arg2[%c0_25, %c0_26] : memref<8x128xf32, #tpu.memory_space<vmem>>, vector<8x128xf32>
      %c0_27 = arith.constant 0 : index
      %c0_28 = arith.constant 0 : index
      %59 = vector.load %arg6[%c0_27, %c0_28] : memref<8x128xf32, #tpu.memory_space<vmem>>, vector<8x128xf32>
      tpu.vector_store %arg6[%c0_27, %c0_28], %58 {strides = array<i32>} : memref<8x128xf32, #tpu.memory_space<vmem>>, vector<8x128xf32>,
    } else {
    }
    %c0 = arith.constant 0 : index
    %c0_1 = arith.constant 0 : index
    %3 = vector.load %arg6[%c0, %c0_1] : memref<8x128xf32, #tpu.memory_space<vmem>>, vector<8x128xf32>
    %c0_2 = arith.constant 0 : index
    %c0_3 = arith.constant 0 : index
    %c0_4 = arith.constant 0 : index
    %4 = vector.load %arg3[%c0_2, %c0_3, %c0_4] : memref<2x128x256xbf16, #tpu.memory_space<vmem>>, vector<1x128x256xbf16>
    %5 = vector.shape_cast %4 : vector<1x128x256xbf16> to vector<128x256xbf16>
    %c0_5 = arith.constant 0 : index
    %c0_6 = arith.constant 0 : index
    %c0_7 = arith.constant 0 : index
    %6 = vector.load %arg4[%c0_5, %c0_6, %c0_7] : memref<2x1x256xf32, #tpu.memory_space<vmem>>, vector<1x1x256xf32>
    %7 = vector.shape_cast %6 : vector<1x1x256xf32> to vector<1x256xf32>
    %8 = arith.truncf %3 : vector<8x128xf32> to vector<8x128xbf16>
    %cst = arith.constant dense<0.000000e+00> : vector<8x256xf32>
    %9 = tpu.matmul %8, %5, %cst {dimension_numbers = #tpu.dot_dimension_numbers<[1], [0], [0], [1], [0, 0, 1, 1], [], []>} : vector<8x128xbf16>, vector<128x256xbf16>, vector<8x256xf32> -> vector<8x256xf32>
    %10 = vector.broadcast %7 : vector<1x256xf32> to vector<8x256xf32>
    %11 = arith.addf %9, %10 : vector<8x256xf32>
    %12 = vector.extract_strided_slice %11 {offsets = [0, 0], sizes = [8, 128], strides = [1, 1]} : vector<8x256xf32> to vector<8x128xf32>
    %cst_8 = arith.constant 0.000000e+00 : f32
    %13 = vector.broadcast %cst_8 : f32 to vector<8x128xf32>
    %14 = arith.maximumf %12, %13 : vector<8x128xf32>
    %15 = vector.extract_strided_slice %11 {offsets = [0, 128], sizes = [8, 128], strides = [1, 1]} : vector<8x256xf32> to vector<8x128xf32>
    %cst_9 = arith.constant dense<0xFF800000> : vector<8xf32>
    %16 = vector.multi_reduction <maximumf>, %15, %cst_9 [1] : vector<8x128xf32> to vector<8xf32>
    %17 = vector.shape_cast %16 : vector<8xf32> to vector<8x1xf32>
    %18 = vector.broadcast %17 : vector<8x1xf32> to vector<8x128xf32>
    %19 = arith.subf %15, %18 : vector<8x128xf32>
    %20 = math.exp %19 : vector<8x128xf32>
    %cst_10 = arith.constant dense<0.000000e+00> : vector<8xf32>
    %21 = vector.multi_reduction <add>, %20, %cst_10 [1] : vector<8x128xf32> to vector<8xf32>
    %22 = vector.shape_cast %21 : vector<8xf32> to vector<8x1xf32>
    %23 = tpu.reciprocal %22 {approx = true} : vector<8x1xf32> -> vector<8x1xf32>
    %24 = vector.broadcast %23 : vector<8x1xf32> to vector<8x128xf32>
    %25 = arith.mulf %20, %24 : vector<8x128xf32>
    %26 = arith.subf %14, %3 : vector<8x128xf32>
    %27 = arith.mulf %25, %26 : vector<8x128xf32>
    %28 = arith.addf %3, %27 : vector<8x128xf32>
    %c1 = arith.constant 1 : index
    %c0_11 = arith.constant 0 : index
    %c0_12 = arith.constant 0 : index
    %29 = vector.load %arg3[%c1, %c0_11, %c0_12] : memref<2x128x256xbf16, #tpu.memory_space<vmem>>, vector<1x128x256xbf16>
    %30 = vector.shape_cast %29 : vector<1x128x256xbf16> to vector<128x256xbf16>
    %c1_13 = arith.constant 1 : index
    %c0_14 = arith.constant 0 : index
    %c0_15 = arith.constant 0 : index
    %31 = vector.load %arg4[%c1_13, %c0_14, %c0_15] : memref<2x1x256xf32, #tpu.memory_space<vmem>>, vector<1x1x256xf32>
    %32 = vector.shape_cast %31 : vector<1x1x256xf32> to vector<1x256xf32>
    %33 = arith.truncf %28 : vector<8x128xf32> to vector<8x128xbf16>
    %cst_16 = arith.constant dense<0.000000e+00> : vector<8x256xf32>
    %34 = tpu.matmul %33, %30, %cst_16 {dimension_numbers = #tpu.dot_dimension_numbers<[1], [0], [0], [1], [0, 0, 1, 1], [], []>} : vector<8x128xbf16>, vector<128x256xbf16>, vector<8x256xf32> -> vector<8x256xf32>
    %35 = vector.broadcast %32 : vector<1x256xf32> to vector<8x256xf32>
    %36 = arith.addf %34, %35 : vector<8x256xf32>
    %37 = vector.extract_strided_slice %36 {offsets = [0, 0], sizes = [8, 128], strides = [1, 1]} : vector<8x256xf32> to vector<8x128xf32>
    %cst_17 = arith.constant 0.000000e+00 : f32
    %38 = vector.broadcast %cst_17 : f32 to vector<8x128xf32>
    %39 = arith.maximumf %37, %38 : vector<8x128xf32>
    %40 = vector.extract_strided_slice %36 {offsets = [0, 128], sizes = [8, 128], strides = [1, 1]} : vector<8x256xf32> to vector<8x128xf32>
    %cst_18 = arith.constant dense<0xFF800000> : vector<8xf32>
    %41 = vector.multi_reduction <maximumf>, %40, %cst_18 [1] : vector<8x128xf32> to vector<8xf32>
    %42 = vector.shape_cast %41 : vector<8xf32> to vector<8x1xf32>
    %43 = vector.broadcast %42 : vector<8x1xf32> to vector<8x128xf32>
    %44 = arith.subf %40, %43 : vector<8x128xf32>
    %45 = math.exp %44 : vector<8x128xf32>
    %cst_19 = arith.constant dense<0.000000e+00> : vector<8xf32>
    %46 = vector.multi_reduction <add>, %45, %cst_19 [1] : vector<8x128xf32> to vector<8xf32>
    %47 = vector.shape_cast %46 : vector<8xf32> to vector<8x1xf32>
    %48 = tpu.reciprocal %47 {approx = true} : vector<8x1xf32> -> vector<8x1xf32>
    %49 = vector.broadcast %48 : vector<8x1xf32> to vector<8x128xf32>
    %50 = arith.mulf %45, %49 : vector<8x128xf32>
    %51 = arith.subf %39, %28 : vector<8x128xf32>
    %52 = arith.mulf %50, %51 : vector<8x128xf32>
    %53 = arith.addf %28, %52 : vector<8x128xf32>
    %c0_20 = arith.constant 0 : index
    %c0_21 = arith.constant 0 : index
    %54 = vector.load %arg6[%c0_20, %c0_21] : memref<8x128xf32, #tpu.memory_space<vmem>>, vector<8x128xf32>
    tpu.vector_store %arg6[%c0_20, %c0_21], %53 {strides = array<i32>} : memref<8x128xf32, #tpu.memory_space<vmem>>, vector<8x128xf32>,
    %c0_22 = arith.constant 0 : index
    %c0_23 = arith.constant 0 : index
    %c0_24 = arith.constant 0 : index
    %55 = vector.load %arg5[%c0_22, %c0_23, %c0_24] : memref<1x8x128xf32, #tpu.memory_space<vmem>>, vector<1x8x128xf32>
    %56 = vector.shape_cast %55 : vector<1x8x128xf32> to vector<8x128xf32>
    %57 = vector.shape_cast %53 : vector<8x128xf32> to vector<1x8x128xf32>
    tpu.vector_store %arg5[%c0_22, %c0_23, %c0_24], %57 {strides = array<i32>} : memref<1x8x128xf32, #tpu.memory_space<vmem>>, vector<1x8x128xf32>,
    return
  }
  func.func @transform_0(%arg0: i32, %arg1: i32) -> (i32, i32) {
    %c0_i32 = arith.constant 0 : i32
    %c0_i32_0 = arith.constant 0 : i32
    return %arg0, %c0_i32 : i32, i32
  }
  func.func @transform_1(%arg0: i32, %arg1: i32) -> (i32, i32, i32) {
    %c0_i32 = arith.constant 0 : i32
    %c0_i32_0 = arith.constant 0 : i32
    %c0_i32_1 = arith.constant 0 : i32
    %c0_i32_2 = arith.constant 0 : i32
    return %c0_i32, %c0_i32_0, %c0_i32_1 : i32, i32, i32
  }
  func.func @transform_2(%arg0: i32, %arg1: i32) -> (i32, i32, i32) {
    %c0_i32 = arith.constant 0 : i32
    %c0_i32_0 = arith.constant 0 : i32
    %c0_i32_1 = arith.constant 0 : i32
    %c0_i32_2 = arith.constant 0 : i32
    return %c0_i32, %c0_i32_0, %c0_i32_1 : i32, i32, i32
  }
  func.func @transform_3(%arg0: i32, %arg1: i32) -> (i32, i32, i32) {
    %c0_i32 = arith.constant 0 : i32
    %c0_i32_0 = arith.constant 0 : i32
    return %arg1, %arg0, %c0_i32 : i32, i32, i32
  }
}

</mosaic_0001>

<bundles_post_ra>
// kernel: tpu_custom_call.1
= control target key start
LH: loop header
LB: loop body
LE: loop exit
PB: predicated region body
PF: predicated region fallthrough
CT: control target
= control target key end

     0   :  { %s1403_s0 = inlined_call_operand.hbm [shape: f32[16,128], index: 0, kind: input, shape index: {}]   ;;  %s1404_s1 = inlined_call_operand.hbm [shape: bf16[2,128,256], index: 1, kind: input, shape index: {}]   ;;  %s1405_s2 = inlined_call_operand.hbm [shape: f32[2,1,256], index: 2, kind: input, shape index: {}]   ;;  %s1406_s3 = inlined_call_operand.hbm [shape: f32[6,16,128], index: 3, kind: output, shape index: {}]  }
   0x1   :  { %1415 = sst [smem:[#allocation17_spill]] %s1404_s1 }
   0x2   :  { %1416 = sst [smem:[#allocation18_spill]] %s1405_s2 }
   0x3   :  { %1417 = sst [smem:[#allocation19_spill]] %s1406_s3 }
   0x4   :  { %8 = vsyncpa [#allocation4], 0 }
   0x5   :  { %10 = vsyncpa [#allocation4 + $0x1], 0 }
   0x6   :  { %11 = vsyncpa [#allocation7], 0 }
   0x7   :  { %12 = vsyncpa [#allocation5], 0 }
   0x8   :  { %14 = vsyncpa [#allocation5 + $0x1], 0  ;;  %s1155_s12 = smov 0   ;;  %s1157_s13 = smov 0  }
   0x9   :  { %s1159_s14 = smov 0   ;;  %s1161_s15 = smov 0  }
   0xa   :  { %s1163_s16 = smov 0   ;;  %s1165_s17 = smov 0  }
   0xb   :  { %s1167_s18 = smov 0   ;;  %s1169_s19 = smov 0  }
   0xc   :  { %s1171_s20 = smov 0   ;;  %s1173_s21 = smov 0  }
   0xd   :  { %s1175_s22 = smov 0  }
   0xe LB: > { %1418 = sst [smem:[#allocation13_spill]] %s1084_s12  ;;  %s685_s23 = sadd.s32 4294967295, %s1124_s22   ;;  %s1124_s22 = sphi %s1175_s22, %s20_s22   ;;  %s1120_s21 = sphi %s1173_s21, %s1447_s21   ;;  %s1116_s20 = sphi %s1171_s20, %s1439_s20   ;;  %s1112_s19 = sphi %s1169_s19, %s1446_s19   ;;  %s1108_s18 = sphi %s1167_s18, %s1438_s18   ;;  %s1104_s17 = sphi %s1165_s17, %s1445_s17   ;;  %s1100_s16 = sphi %s1163_s16, %s1444_s16   ;;  %s1096_s15 = sphi %s1161_s15, %s1443_s15   ;;  %s1092_s14 = sphi %s1159_s14, %s1442_s14   ;;  %s1088_s13 = sphi %s1157_s13, %s1441_s13   ;;  %s1084_s12 = sphi %s1155_s12, %s1440_s12  }
   0xf   : > { %1419 = sst [smem:[#allocation14_spill]] %s1116_s20  ;;  %s686_s24 = sadd.s32 4294967294, %s1124_s22  }
  0x10   : > { %p52_p0 = scmp.ne.s32.totalorder %s1100_s16, %s1096_s15  ;;  %p1211_p1 = scmp.eq.s32.totalorder %s685_s23, 0 }
  0x11   : > { %p119_p2 = scmp.ne.s32.totalorder %s1092_s14, %s1088_s13  ;;  %p120_p3 = scmp.eq.s32.totalorder %s685_s23, 11 }
  0x12   : > { %s1420_s25 = scalar_select %p1211_p1, 1, 0 }
  0x13   : > { %p1219_p4 = por %p1211_p1, %p52_p0  ;;  %p125_p5 = scmp.ne.s32.totalorder %s1088_s13, %s1084_s12 }
  0x14   : > { %p1225_p6 = por %p120_p3, %p119_p2  ;;  %p126_p7 = scmp.eq.s32.totalorder %s686_s24, 11 }
  0x15   : > { %p687_p8 = scmp.ge.s32.totalorder %s1124_s22, 1  ;;  %p133_p9 = scmp.lt.s32.totalorder %s1124_s22, 13 }
  0x16   : > { %s1422_s27 = scalar_select %p1225_p6, 1, 0 }
  0x17   : > { %p1231_p10 = por %p126_p7, %p125_p5  ;;  %p1235_p11 = pnand %p687_p8, %p133_p9 }
  0x18   : > { %s1126_s30 = smov [#allocation6]   ;;  %s1127_s6 = smov [#allocation8]  }
  0x19   : > { %s1423_s28 = scalar_select %p1231_p10, 1, 0 }
  0x1a   : > { %s145_s4 = sshll.u32 %s1126_s30, 4  ;;  %p748_p12 = pneg %p1235_p11  ;;  %s146_s4 = int_to_ptr.vmem [resolvable:$true] %s145_s4 }
  0x1b   : > { %1424 = sst [smem:[#allocation15_spill]] %s1423_s28  ;;  %s158_s7 = sshll.u32 %s1127_s6, 4  ;;  %s159_s7 = int_to_ptr.vmem [resolvable:$true] %s158_s7 }
  0x1c   : > { %p1243_p13 = pnand %p748_p12, %p1211_p1  ;;  %s931_s8 = scalar_lea.vmem %s146_s4, 4096 }
  0x1d   : > { %p932_p2 = scmp.ne.s32.totalorder %s146_s4, %s931_s8  ;;  %p939_p7 = scmp.lt.s32.totalorder %s146_s4, %s146_s4 }
  0x1e   : > { %p922_p0 = pneg %p1243_p13  ;;  %p940_p8 = scmp.lt.s32.totalorder %s931_s8, %s931_s8 }
  0x20   : > { %p934_p3 = pnand %p932_p2, %p922_p0  ;;  %p941_p9 = por %p940_p8, %p939_p7 }
  0x22   : > { %p935_p5 = pneg %p934_p3 }
  0x24   : > { %p942_p12 = pnand %p941_p9, %p935_p5 }
  0x26   : > { %945 = shalt.err (!%p942_p12)
}
  0x27   : > { %s1128_s9 = smov 128   ;;  %s1129_s10 = smov 8  }
  0x28   : > { %s1427_s1 = sld [smem:[#allocation17_spill]]  ;;  %s957_s23 = scalar_lea.vmem %s159_s7, 64 }
  0x29   : > { %p958_p10 = scmp.ne.s32.totalorder %s159_s7, %s957_s23  ;;  %p965_p6 = scmp.lt.s32.totalorder %s159_s7, %s159_s7 }
  0x2a   : > { %p966_p1 = scmp.lt.s32.totalorder %s957_s23, %s957_s23 }
  0x2b   : > { %p960_p2 = pnand %p958_p10, %p922_p0 }
  0x2c   : > { %p967_p7 = por %p966_p1, %p965_p6 }
  0x2d   : > { %p961_p3 = pneg %p960_p2 }
  0x2e   : > { %751 = dma.hbm_to_vmem [thread:$0]  (!%p1243_p13), %s1427_s1, 4096, %s146_s4, [#allocation7], %s1128_s9, %s1128_s9, %s1129_s10  }
  0x2f   : > { %p968_p5 = pnand %p967_p7, %p961_p3 }
  0x31   : > { %971 = shalt.err (!%p968_p5)
}
  0x32   : > { %s1130_s24 = smov 32   ;;  %s1131_s30 = smov 2  }
  0x33   : > { %s1428_s2 = sld [smem:[#allocation18_spill]]  ;;  %s29_s8 = sadd.s32 1, %s1116_s20 }
  0x34   : > { %p30_p1 = scmp.ge.s32.totalorder %s29_s8, 6  ;;  %s32_s9 = sadd.s32 1, %s1120_s21 }
  0x35   : > { %s39_s10 = sadd.s32 1, %s1104_s17  ;;  %p46_p6 = scmp.ne.s32.totalorder %s1104_s17, %s1100_s16 }
  0x36   : > { %s1449_s8 = smov (%p30_p1, %s29_s8), 0  ;;  %s1451_s9 = smov (!%p30_p1, %s32_s9), %s1120_s21 }
  0x37   : > { %1429 = sst [smem:[#allocation16_spill]] %s1449_s8  ;;  %p47_p10 = scmp.eq.s32.totalorder %s1124_s22, 0 }
  0x38   : > { %s104_s5 = ssub.s32 %s1116_s20, %s1449_s8  ;;  %p34_p0 = scmp.ge.s32.totalorder %s1451_s9, 2 }
  0x39   : > { %754 = dma.hbm_to_vmem [thread:$0]  (!%p1243_p13), %s1428_s2, 64, %s159_s7, [#allocation7], %s1130_s24, %s1130_s24, %s1131_s30  }
  0x3a   : > { %s109_s11 = sadd.s32 1, %s1092_s14  ;;  %p1277_p8 = por %p47_p10, %p46_p6 }
  0x3b   : > { %p765_p13 = scmp.lt.s32.totalorder %s1124_s22, 12  ;;  %s1453_s9 = smov (%p34_p0, %s1451_s9), 0 }
  0x3c   : > { %s172_s15 = sand.u32 1, %s1104_s17   ;;  %s692_s23 = sshll.u32 %s1120_s21, 7 }
  0x3d   : > { %s36_s24 = ssub.s32 %s1120_s21, %s1453_s9  ;;  %s691_s4 = sshll.u32 %s172_s15, 3 }
  0x3e   : > { %p37_p9 = scmp.eq.s32.totalorder %s36_s24, 0  ;;  %s106_s30 = sor.u32 %s104_s5, %s36_s24 }
  0x3f   : > { %p107_p12 = scmp.eq.s32.totalorder %s106_s30, 0  ;;  %s181_s20 = scalar_lea.hbm %s1403_s0, %s692_s23 }
  0x40   : > { %s1289_s6 = scalar_select %p37_p9, %s1104_s17, %s39_s10  }
  0x41   : > { %s1292_s1 = scalar_select %p107_p12, %s1092_s14, %s109_s11  }
  0x42   : > { %s176_s28 = scalar_lea.vmem [#allocation3], %s691_s4  ;;  %p1301_p2 = pnand %p765_p13, %p1277_p8 }
  0x43   : > { %s183_s12 = sshll.u32 %s176_s28, 4  ;;  %s173_s5 = scalar_lea.sflag [#allocation4], %s172_s15  ;;  %s184_s12 = int_to_ptr.vmem [resolvable:$true] %s183_s12 }
  0x44   : > { %p974_p3 = pneg %p1301_p2  ;;  %s985_s10 = scalar_lea.vmem %s184_s12, 128 }
  0x45   : > { %p986_p7 = scmp.ne.s32.totalorder %s184_s12, %s985_s10  ;;  %s1132_s11 = smov [#allocation3]  }
  0x46   : > { %s990_s2 = sshll.u32 %s1132_s11, 4  ;;  %s991_s2 = int_to_ptr.vmem [resolvable:$false] %s990_s2 }
  0x47   : > { %p988_p5 = pnand %p986_p7, %p974_p3  ;;  %s992_s8 = scalar_lea.vmem %s991_s2, 256 }
  0x48   : > { %p993_p6 = scmp.lt.s32.totalorder %s184_s12, %s991_s2  ;;  %p994_p10 = scmp.lt.s32.totalorder %s992_s8, %s985_s10 }
  0x49   : > { %p989_p1 = pneg %p988_p5 }
  0x4a   : > { %p995_p0 = por %p994_p10, %p993_p6 }
  0x4c   : > { %p996_p8 = pnand %p995_p0, %p989_p1 }
  0x4e   : > { %999 = shalt.err (!%p996_p8)
}
  0x4f   : > { %758 = dma.hbm_to_vmem [thread:$0]  (!%p1301_p2), %s181_s20, 128, %s184_s12, %s173_s5  }
  0x50   : > { %192 = sbr.rel (%p1235_p11) target bundleno = 1169 (0x491), region = 32  ;;  %s194_s28 = sand.u32 (!%p1235_p11), 1, %s1100_s16  }
  0x51   : > { %s694_s7 = sshll.u32 (!%p1235_p11), %s194_s28, 3  ;;  %s195_s15 = scalar_lea.sflag (!%p1235_p11), [#allocation4], %s194_s28 }
  0x52   : > { %s198_s23 = scalar_lea.vmem (!%p1235_p11), [#allocation3], %s694_s7 }
  0x55   : > { %1071 = dma.done.wait (%p1219_p4), %s195_s15, 128  }
  0x56   : > { %1073 = vsyncadd (%p1219_p4), %s195_s15, 4294967168  ;;  %p1432_p13 = scmp.ne.s32.totalorder %s1420_s25, 0 }
  0x58   : > { %1075 = dma.done.wait (%p1432_p13), [#allocation7], 4160  }
  0x59   : > { %1077 = vsyncadd (%p1432_p13), [#allocation7], 4294963136  ;;  %s226_s3 = sand.u32 1, %s1088_s13   ;;  %p698_p11 = scmp.ne.s32.totalorder %s1108_s18, 0 }
  0x5a   : > { %s1323_s12 = sshll.u32 %s226_s3, 3 }
  0x5b   : > { %s228_s20 = scalar_lea.vmem [#allocation9], %s1323_s12  ;;  %233 = sbr.rel (%p698_p11) target bundleno = 98 (0x62), region = 48 }
  0x60   : > { %v234_v0 = vld [vmem:[%s198_s23] sm:$0xff] }
  0x61   : > { %235 = vst [vmem:[#allocation2] sm:$0xff] %v234_v0 }
  0x62 PF: > { %v864_v1 = vld [vmem:[#allocation6 + $0x74] ss:$8 sps:$4 sm:$0xff]   ;;  %v866_v2 = vld [vmem:[#allocation6 + $0x70] ss:$8 sps:$4 sm:$0xff]   ;;  %v1133_v3 = vmov 0   ;;  %v256_v20 = vlaneseq  ;;  %s732_s25 = sshll.u32 %s1108_s18, 1 }
  0x63   : > { %378 = vmatprep.mubr.bf16.mxu0 %v1133_v3  ;;  %543 = vmatprep.mubr.bf16.mxu1 %v1133_v3  ;;  %v867_v4 = vld [vmem:[#allocation6 + $0x64] ss:$8 sps:$4 sm:$0xff]   ;;  %v869_v5 = vld [vmem:[#allocation6 + $0x60] ss:$8 sps:$4 sm:$0xff]   ;;  %v870_v6 = vld [vmem:[#allocation6 + $0x54] ss:$8 sps:$4 sm:$0xff]   ;;  %s579_s26 = sadd.s32 %s1112_s19, %s732_s25 }
  0x64   : > { %346 = vmatprep.subr.bf16.mxu0 %v864_v1  ;;  %v872_v7 = vld [vmem:[#allocation6 + $0x50] ss:$8 sps:$4 sm:$0xff]   ;;  %v873_v8 = vld [vmem:[#allocation6 + $0x44] ss:$8 sps:$4 sm:$0xff]   ;;  %v875_v9 = vld [vmem:[#allocation6 + $0x40] ss:$8 sps:$4 sm:$0xff]  }
  0x65   : > { %347 = vmatpush1.bf16.msra.mxu0 %v866_v2  ;;  %v876_v10 = vld [vmem:[#allocation6 + $0x34] ss:$8 sps:$4 sm:$0xff]   ;;  %v878_v11 = vld [vmem:[#allocation6 + $0x30] ss:$8 sps:$4 sm:$0xff]   ;;  %v879_v12 = vld [vmem:[#allocation6 + $0x24] ss:$8 sps:$4 sm:$0xff]  }
  0x66   : > { %348 = vmatprep.subr.bf16.mxu0 %v867_v4  ;;  %v881_v13 = vld [vmem:[#allocation6 + $0x20] ss:$8 sps:$4 sm:$0xff]   ;;  %v882_v14 = vld [vmem:[#allocation6 + $0x14] ss:$8 sps:$4 sm:$0xff]   ;;  %v884_v15 = vld [vmem:[#allocation6 + $0x10] ss:$8 sps:$4 sm:$0xff]  }
  0x67   : > { %v885_v16 = vld [vmem:[#allocation6 + $0x4] ss:$8 sps:$4 sm:$0xff]   ;;  %v887_v17 = vld [vmem:[#allocation6] ss:$8 sps:$4 sm:$0xff]   ;;  %v1331_v21 = vshrl.u32 %v256_v20, 7  ;;  %s733_s29 = sshll.u32 %s579_s26, 7 }
  0x68   : > { %v1327_v18 = vld [vmem:[#allocation2] sm:$0xff]  ;;  %v253_v23 = vld [vmem:[#allocation8] sm:$0x3]  ;;  %v888_v30 = vld [vmem:[#allocation6 + $0xf4] ss:$8 sps:$4 sm:$0xff]   ;;  %s583_s24 = sshll.u32 %s228_s20, 4  ;;  %s584_s24 = int_to_ptr.vmem [resolvable:$true] %s583_s24 }
  0x69   : > { %349 = vmatpush1.bf16.msra.mxu0 %v869_v5  ;;  %v254_v19 = vpack.c.bf16 %v1327_v18, %v1327_v18  ;;  %v262_v22 = vsub.s32 1, %v1331_v21  ;;  %v890_v31 = vld [vmem:[#allocation6 + $0xf0] ss:$8 sps:$4 sm:$0xff]   ;;  %v891_v32 = vld [vmem:[#allocation6 + $0xe4] ss:$8 sps:$4 sm:$0xff]   ;;  %511 = vmatprep.subr.bf16.mxu1 %v888_v30  ;;  %v258_v50 = vsub.s32 0, %v1331_v21 }
  0x6a   : > { %350 = vmatprep.subr.bf16.mxu0 %v870_v6  ;;  %512 = vmatpush1.bf16.msra.mxu1 %v890_v31  ;;  %v893_v33 = vld [vmem:[#allocation6 + $0xe0] ss:$8 sps:$4 sm:$0xff]   ;;  %v894_v34 = vld [vmem:[#allocation6 + $0xd4] ss:$8 sps:$4 sm:$0xff]   ;;  %v896_v35 = vld [vmem:[#allocation6 + $0xd0] ss:$8 sps:$4 sm:$0xff]  }
  0x6b   : > { %v263_v24 = vrot.slane %v253_v23, %v262_v22  ;;  %513 = vmatprep.subr.bf16.mxu1 %v891_v32  ;;  %v897_v40 = vld [vmem:[#allocation6 + $0xc4] ss:$8 sps:$4 sm:$0xff]   ;;  %v899_v41 = vld [vmem:[#allocation6 + $0xc0] ss:$8 sps:$4 sm:$0xff]   ;;  %v900_v42 = vld [vmem:[#allocation6 + $0xb4] ss:$8 sps:$4 sm:$0xff]   ;;  %v259_v52 = vrot.slane %v253_v23, %v258_v50 }
  0x6c   : > { %v902_v43 = vld [vmem:[#allocation6 + $0xb0] ss:$8 sps:$4 sm:$0xff]   ;;  %v903_v44 = vld [vmem:[#allocation6 + $0xa4] ss:$8 sps:$4 sm:$0xff]   ;;  %v905_v45 = vld [vmem:[#allocation6 + $0xa0] ss:$8 sps:$4 sm:$0xff]  }
  0x6d   : > { %351 = vmatpush1.bf16.msra.mxu0 %v872_v7  ;;  %v906_v46 = vld [vmem:[#allocation6 + $0x94] ss:$8 sps:$4 sm:$0xff]   ;;  %v908_v47 = vld [vmem:[#allocation6 + $0x90] ss:$8 sps:$4 sm:$0xff]   ;;  %v909_v48 = vld [vmem:[#allocation6 + $0x84] ss:$8 sps:$4 sm:$0xff]  }
  0x6e   : > { %352 = vmatprep.subr.bf16.mxu0 %v873_v8  ;;  %514 = vmatpush1.bf16.msra.mxu1 %v893_v33  ;;  %v911_v49 = vld [vmem:[#allocation6 + $0x80] ss:$8 sps:$4 sm:$0xff]   ;;  %s1433_s5 = sld [smem:[#allocation19_spill]]  ;;  %s568_s18 = scalar_lea.sflag [#allocation5], %s226_s3 }
  0x6f   : > { %515 = vmatprep.subr.bf16.mxu1 %v894_v34  ;;  %v418_v61 = vld [vmem:[#allocation8 + $0x2] sm:$0x3]  ;;  %s1000_s19 = scalar_lea.vmem %s584_s24, 128  ;;  %p1434_p9 = scmp.ne.s32.totalorder %s1422_s27, 0 }
  0x70   : > { %v428_v62 = vrot.slane %v418_v61, %v262_v22  ;;  %p1001_p4 = scmp.ne.s32.totalorder %s584_s24, %s1000_s19  ;;  %s1134_s11 = smov [#allocation9]  }
  0x71   : > { %353 = vmatpush1.bf16.msra.mxu0 %v875_v9  ;;  %v424_v9 = vrot.slane %v418_v61, %v258_v50  ;;  %s1004_s2 = sshll.u32 %s1134_s11, 4  ;;  %s1005_s2 = int_to_ptr.vmem [resolvable:$false] %s1004_s2 }
  0x72   : > { %354 = vmatprep.subr.bf16.mxu0 %v876_v10  ;;  %516 = vmatpush1.bf16.msra.mxu1 %v896_v35  ;;  %p1002_p12 = pnand %p1001_p4, %p1434_p9  ;;  %s1006_s8 = scalar_lea.vmem %s1005_s2, 256 }
  0x73   : > { %517 = vmatprep.subr.bf16.mxu1 %v897_v40  ;;  %p1007_p3 = scmp.lt.s32.totalorder %s584_s24, %s1005_s2  ;;  %p1008_p7 = scmp.lt.s32.totalorder %s1006_s8, %s1000_s19 }
  0x74   : > { %s1344_s10 = scalar_lea.hbm %s1433_s5, %s733_s29  ;;  %p1003_p2 = pneg %p1002_p12 }
  0x75   : > { %355 = vmatpush1.bf16.msra.mxu0 %v878_v11  ;;  %p1009_p5 = por %p1008_p7, %p1007_p3 }
  0x76   : > { %356 = vmatprep.subr.bf16.mxu0 %v879_v12  ;;  %518 = vmatpush1.bf16.msra.mxu1 %v899_v41 }
  0x77   : > { %519 = vmatprep.subr.bf16.mxu1 %v900_v42  ;;  %p1010_p1 = pnand %p1009_p5, %p1003_p2 }
  0x79   : > { %357 = vmatpush1.bf16.msra.mxu0 %v881_v13 }
  0x7a   : > { %358 = vmatprep.subr.bf16.mxu0 %v882_v14  ;;  %520 = vmatpush1.bf16.msra.mxu1 %v902_v43 }
  0x7b   : > { %521 = vmatprep.subr.bf16.mxu1 %v903_v44 }
  0x7d   : > { %359 = vmatpush1.bf16.msra.mxu0 %v884_v15 }
  0x7e   : > { %360 = vmatprep.subr.bf16.mxu0 %v885_v16  ;;  %522 = vmatpush1.bf16.msra.mxu1 %v905_v45 }
  0x7f   : > { %523 = vmatprep.subr.bf16.mxu1 %v906_v46 }
  0x81   : > { %361 = vmatpush1.bf16.msra.mxu0 %v887_v17 }
  0x82   : > { %524 = vmatpush1.bf16.msra.mxu1 %v908_v47 }
  0x83   : > { %525 = vmatprep.subr.bf16.mxu1 %v909_v48 }
  0x84   : > { %379 = vmatmul.mubr.bf16.vlgmr.msra.gmra.mxu0 %v254_v19 }
  0x86   : > { %526 = vmatpush1.bf16.msra.mxu1 %v911_v49 }
 0x144   : > { %v380_v25 = vpop.f32.mrf.mxu0 }
 0x145   : > { %v381_v53 = vadd.f32 %v380_v25, %v259_v52 }
 0x146   : > { %v382_v26 = vpop.f32.mrf.mxu0 }
 0x147   : > { %v383_v27 = vadd.f32 %v382_v26, %v263_v24  ;;  %v387_v54 = vmax.f32 %v381_v53, 0.0 }
 0x148   : > { %v384_v28 = vpop.f32.mrf.mxu0 }
 0x149   : > { %388 = vmax.xlane.f32.xlu0 %v383_v27  ;;  %v397_v56 = vsub.f32 %v387_v54, %v1327_v18 }
 0x14a   : > { %v385_v29 = vpop.f32.mrf.mxu0 }
 0x1d2   : > { %v389_v36 = vpop.xlane.xlu0 %388 }
 0x1d3   : > { %v390_v37 = vsub.f32 %v383_v27, %v389_v36 }
 0x1d5   : > { %v391_v38 = vmul.f32 1.442695, %v390_v37 }
 0x1d7   : > { %912 = vpow2.f32 %v391_v38 }
 0x1e4   : > { %v913_v39 = vpop.eup %912 }
 0x1e5   : > { %393 = vadd.xlane.f32.xlu0 %v913_v39 }
 0x26e   : > { %v394_v51 = vpop.xlane.xlu0 %393 }
 0x26f   : > { %914 = vrcp.f32 %v394_v51 }
 0x27c   : > { %v915_v55 = vpop.eup %914 }
 0x27d   : > { %v396_v57 = vmul.f32 %v915_v55, %v913_v39 }
 0x27f   : > { %v398_v58 = vmul.f32 %v397_v56, %v396_v57 }
 0x281   : > { %v399_v59 = vadd.f32 %v398_v58, %v1327_v18 }
 0x283   : > { %v419_v60 = vpack.c.bf16 %v399_v59, %v399_v59 }
 0x285   : > { %544 = vmatmul.mubr.bf16.vlgmr.msra.gmra.mxu1 %v419_v60 }
 0x345   : > { %v545_v63 = vpop.f32.mrf.mxu1 }
 0x346   : > { %v546_v10 = vadd.f32 %v545_v63, %v424_v9 }
 0x347   : > { %v547_v0 = vpop.f32.mrf.mxu1 }
 0x348   : > { %v548_v1 = vadd.f32 %v547_v0, %v428_v62  ;;  %v552_v11 = vmax.f32 %v546_v10, 0.0 }
 0x349   : > { %v549_v2 = vpop.f32.mrf.mxu1 }
 0x34a   : > { %553 = vmax.xlane.f32.xlu1 %v548_v1  ;;  %v562_v13 = vsub.f32 %v552_v11, %v399_v59 }
 0x34b   : > { %v550_v3 = vpop.f32.mrf.mxu1 }
 0x3d3   : > { %v554_v4 = vpop.xlane.xlu1 %553 }
 0x3d4   : > { %v555_v5 = vsub.f32 %v548_v1, %v554_v4 }
 0x3d6   : > { %v556_v6 = vmul.f32 1.442695, %v555_v5 }
 0x3d8   : > { %916 = vpow2.f32 %v556_v6 }
 0x3e5   : > { %v917_v7 = vpop.eup %916 }
 0x3e6   : > { %558 = vadd.xlane.f32.xlu1 %v917_v7 }
 0x46f   : > { %v559_v8 = vpop.xlane.xlu1 %558 }
 0x470   : > { %918 = vrcp.f32 %v559_v8 }
 0x47d   : > { %v919_v12 = vpop.eup %918 }
 0x47e   : > { %v561_v14 = vmul.f32 %v919_v12, %v917_v7 }
 0x480   : > { %v563_v15 = vmul.f32 %v562_v13, %v561_v14 }
 0x482   : > { %v564_v16 = vadd.f32 %v563_v15, %v399_v59 }
 0x484   : > { %565 = vst [vmem:[#allocation2] sm:$0xff] %v564_v16  ;;  %566 = vst [vmem:[%s228_s20] sm:$0xff] %v564_v16 }
 0x485   : > { %1013 = shalt.err (!%p1010_p1)
}
 0x486   : > { %s1014_s28 = scalar_lea.hbm %s1344_s10, 128  ;;  %s1018_s23 = scalar_lea.hbm %s1433_s5, 1536 }
 0x487   : > { %p1015_p6 = scmp.ne.s32.totalorder %s1344_s10, %s1014_s28  ;;  %p1019_p8 = scmp.lt.s32.totalorder %s1344_s10, %s1433_s5 }
 0x488   : > { %p1020_p13 = scmp.lt.s32.totalorder %s1018_s23, %s1014_s28 }
 0x489   : > { %p1016_p10 = pnand %p1015_p6, %p1434_p9 }
 0x48a   : > { %p1021_p11 = por %p1020_p13, %p1019_p8 }
 0x48b   : > { %p1017_p0 = pneg %p1016_p10 }
 0x48d   : > { %p1022_p4 = pnand %p1021_p11, %p1017_p0 }
 0x48f   : > { %1025 = shalt.err (!%p1022_p4)
}
 0x490   : > { %746 = dma.vmem_to_hbm [thread:$0]  (%p1434_p9), %s584_s24, 128, %s1344_s10, %s568_s18  }
 0x491 PF: > { %s1435_s20 = sld [smem:[#allocation13_spill]]  ;;  %p768_p12 = scmp.ge.s32.totalorder %s1124_s22, 2 }
 0x492   : > { %s1436_s25 = sld [smem:[#allocation15_spill]] }
 0x497   : > { %s595_s26 = sand.u32 1, %s1435_s20  }
 0x498   : > { %p1437_p2 = scmp.ne.s32.totalorder %s1436_s25, 0  ;;  %s596_s29 = scalar_lea.sflag [#allocation5], %s595_s26 }
 0x49a   : > { %p760_p3 = pnand %p768_p12, %p1437_p2 }
 0x49c   : > { %p761_p7 = pneg %p760_p3 }
 0x49e   : > { %1079 = dma.done.wait (%p761_p7), %s596_s29, 128  }
 0x49f   : > { %1081 = vsyncadd (%p761_p7), %s596_s29, 4294967168  ;;  %s20_s22 = sadd.s32 1, %s1124_s22   ;;  %s1438_s18 = sld [smem:[#allocation14_spill]] }
 0x4a0   : > { %p17_p5 = scmp.ge.s32.totalorder %s20_s22, 14   ;;  %s1439_s20 = sld [smem:[#allocation16_spill]] }
 0x4a1   : > { %s1440_s12 = smov %s1088_s13  ;;  %s1441_s13 = smov %s1092_s14 }
 0x4a2   : > { %s1442_s14 = smov %s1292_s1  ;;  %s1443_s15 = smov %s1100_s16 }
 0x4a3   : > { %s1444_s16 = smov %s1104_s17  ;;  %s1445_s17 = smov %s1289_s6 }
 0x4a4   : > { %s1446_s19 = smov %s1120_s21  ;;  %s1447_s21 = smov %s1453_s9 }
 0x4a5   :  { %19 = sbr.rel (!%p17_p5) target bundleno = 14 (0xe), region = 91 }
 0x4aa   :  { %601 = vsyncpa [#allocation4], 1 }
 0x4ab   :  { %603 = vsyncpa [#allocation4 + $0x1], 1 }
 0x4ac   :  { %604 = vsyncpa [#allocation7], 1 }
 0x4ad   :  { %605 = vsyncpa [#allocation5], 1 }
 0x4ae   :  { %607 = vsyncpa [#allocation5 + $0x1], 1 }

</bundles_post_ra>
